<compile_context>
chip_gen: v7x
topology: tpu7x:2x2x1
jax: 0.10.0
libtpu: 0.0.40
codegen_flags: <defaults>
</compile_context>

<pallas_src>
import functools
import math

import jax
import jax.numpy as jnp
from jax.experimental import pallas as pl
from jax.experimental.pallas import tpu as pltpu


def _vae_kernel(x_ref, w0_ref, b0_ref, wh_ref, bh_ref, eps_ref,
                z_ref, kl_ref, *, z_size, inv_sp2, log_sp2):
    # Hidden layer: relu(x @ W0 + b0).  bf16 operands, f32 accumulation.
    h = jnp.dot(x_ref[...], w0_ref[...], preferred_element_type=jnp.float32)
    h = jnp.maximum(h + b0_ref[...], 0.0)

    # Fused mu/sigma heads: one (block_b, 2*z) matmul instead of two z-wide ones.
    heads = jnp.dot(h.astype(wh_ref.dtype), wh_ref[...],
                    preferred_element_type=jnp.float32) + bh_ref[...]
    mu = heads[:, :z_size]
    s_lin = heads[:, z_size:]          # = log(sigma), pre-exp linear output
    sigma = jnp.exp(s_lin)

    # Reparameterized sample.
    z_ref[...] = (mu + sigma * eps_ref[...]).astype(z_ref.dtype)

    # KL(N(mu, sigma) || N(0, sigma_prior)) per row, using the identity
    # log(sigma^2/sp^2) = 2*s_lin - log(sp^2)  (no extra log, no divide).
    terms = (sigma * sigma + mu * mu) * inv_sp2 - 2.0 * s_lin + (log_sp2 - 1.0)
    kl = 0.5 * jnp.sum(terms, axis=1, keepdims=True)            # (block_b, 1)
    # Lane-dense store: replicate across the 128 lanes; wrapper reads column 0.
    kl_ref[...] = jnp.broadcast_to(kl, kl_ref.shape).astype(kl_ref.dtype)


def prepare_params(params, compute_dtype=jnp.bfloat16):
    """Fuse the mu/sigma heads and cast matmul weights to the DMA/MXU dtype."""
    w_heads = jnp.concatenate([params["wmu"], params["wsig"]], axis=1)
    b_heads = jnp.concatenate([params["bmu"], params["bsig"]], axis=1)
    return {
        "w0": params["w0"].astype(compute_dtype),
        "b0": params["b0"].astype(jnp.float32),
        "w_heads": w_heads.astype(compute_dtype),
        "b_heads": b_heads.astype(jnp.float32),
    }


def _pick_block_b(batch):
    # Big tiles amortize the ~0.35us per-step pipeline overhead, but keep at
    # least 2 grid steps once the batch allows it so v7x's two TensorCores
    # (dimension_semantics="parallel") both get work.
    if batch <= 16:
        bb = batch
    else:
        bb = min(512, pl.cdiv(batch, 2))
    return max(8, ((bb + 7) // 8) * 8)     # sublane-align


def variational_encoder_forward(x, prep, eps, *, sigma_prior=1.0, block_b=None):
    """Returns (z, kl) matching the PyTorch module's forward (z) and self.kl."""
    B = x.shape[0]
    x2d = x.reshape(B, -1).astype(prep["w0"].dtype)   # flatten + bf16 DMA stream
    d_in = x2d.shape[1]
    z_size = prep["w0"].shape[1]
    assert prep["w_heads"].shape == (z_size, 2 * z_size)

    if block_b is None:
        block_b = _pick_block_b(B)
    grid_n = pl.cdiv(B, block_b)
    b_pad = grid_n * block_b
    if b_pad != B:                                    # ragged batch: pad, slice later
        x2d = jnp.pad(x2d, ((0, b_pad - B), (0, 0)))
        eps = jnp.pad(eps, ((0, b_pad - B), (0, 0)))
    eps = eps.astype(jnp.float32)

    sp2 = float(sigma_prior) ** 2
    kernel = functools.partial(_vae_kernel, z_size=z_size,
                               inv_sp2=1.0 / sp2, log_sp2=math.log(sp2))

    # Constant operands: block index never changes.
    const_spec = lambda shape: pl.BlockSpec(shape, lambda i: (0, 0))

    # VMEM budget: double-buffered batch tiles + (double-buffered) constants,
    # capped below v7x's 64 MiB physical VMEM.
    itm = x2d.dtype.itemsize
    tile_bytes = 2 * block_b * (d_in * itm + z_size * 4 + z_size * 4 + 128 * 4)
    const_bytes = 2 * (prep["w0"].size * prep["w0"].dtype.itemsize
                       + prep["w_heads"].size * prep["w_heads"].dtype.itemsize
                       + (prep["b0"].size + prep["b_heads"].size) * 4)
    vmem_limit = int(min(max(2 * (tile_bytes + const_bytes), 32 * 2**20), 48 * 2**20))

    z, kl = pl.pallas_call(
        kernel,
        out_shape=(
            jax.ShapeDtypeStruct((b_pad, z_size), jnp.float32),
            jax.ShapeDtypeStruct((b_pad, 128), jnp.float32),   # lane-dense kl slab
        ),
        grid_spec=pltpu.PrefetchScalarGridSpec(
            num_scalar_prefetch=0,
            grid=(grid_n,),
            in_specs=[
                pl.BlockSpec((block_b, d_in), lambda i: (i, 0)),     # x (bf16)
                const_spec((d_in, z_size)),                          # W0
                const_spec((1, z_size)),                             # b0
                const_spec((z_size, 2 * z_size)),                    # [Wmu | Wsig]
                const_spec((1, 2 * z_size)),                         # [bmu | bsig]
                pl.BlockSpec((block_b, z_size), lambda i: (i, 0)),   # eps
            ],
            out_specs=[
                pl.BlockSpec((block_b, z_size), lambda i: (i, 0)),   # z
                pl.BlockSpec((block_b, 128), lambda i: (i, 0)),      # kl
            ],
        ),
        compiler_params=pltpu.CompilerParams(
            dimension_semantics=("parallel",),
            vmem_limit_bytes=vmem_limit,
        ),
    )(x2d, prep["w0"], prep["b0"], prep["w_heads"], prep["b_heads"], eps)

    return z[:B], kl[:B, 0]


def init_params(key, var_input_dim, z_size, dtype=jnp.float32):
    """Deterministic synthetic init (PyTorch-Linear-style uniform bounds)."""
    ks = jax.random.split(key, 6)

    def lin(kw, kb, fan_in, fan_out):
        bound = 1.0 / jnp.sqrt(fan_in)
        w = jax.random.uniform(kw, (fan_in, fan_out), dtype, -bound, bound)
        b = jax.random.uniform(kb, (1, fan_out), dtype, -bound, bound)
        return w, b

    w0, b0 = lin(ks[0], ks[1], var_input_dim, z_size)
    wmu, bmu = lin(ks[2], ks[3], z_size, z_size)
    wsig, bsig = lin(ks[4], ks[5], z_size, z_size)
    return {"w0": w0, "b0": b0, "wmu": wmu, "bmu": bmu,
            "wsig": wsig, "bsig": bsig}


if __name__ == "__main__":
    # batch=256, (4, 8, 8) feature map -> var_input_dim=256, latent z_size=128.
    # B=256 with block_b=128 gives a 2-step grid (both v7x TensorCores used).
    B, C, H, W = 256, 4, 8, 8
    var_input_dim = C * H * W        # 256
    z_size = 128
    sigma_prior = 1.3

    key = jax.random.PRNGKey(0)
    kx, kp, ke = jax.random.split(key, 3)

    x = jax.random.normal(kx, (B, C, H, W), dtype=jnp.float32)
    params = init_params(kp, var_input_dim, z_size)
    # eps ~ N(0, sigma_prior): drawn outside the kernel for bit-parity with the
    # module's torch.distributions.Normal sample.
    # TODO(synk): could instead draw eps in-kernel via pltpu.prng_seed +
    # pltpu.stateful_normal to drop one HBM input stream.
    eps = jax.random.normal(ke, (B, z_size), dtype=jnp.float32) * sigma_prior

    prep = prepare_params(params)
    z, kl = variational_encoder_forward(x, prep, eps, sigma_prior=sigma_prior)
    jax.block_until_ready((z, kl))

    # Pure-JAX reference, mirroring the kernel's bf16 weight/activation rounding.
    f32 = jnp.float32
    bf16 = jnp.bfloat16
    x2d_r = x.reshape(B, -1).astype(bf16).astype(f32)
    w0_r = params["w0"].astype(bf16).astype(f32)
    wmu_r = params["wmu"].astype(bf16).astype(f32)
    wsig_r = params["wsig"].astype(bf16).astype(f32)
    h_r = jnp.maximum(x2d_r @ w0_r + params["b0"], 0.0)
    hb_r = h_r.astype(bf16).astype(f32)
    mu_r = hb_r @ wmu_r + params["bmu"]
    sigma_r = jnp.exp(hb_r @ wsig_r + params["bsig"])
    z_ref = mu_r + sigma_r * eps
    sp2 = sigma_prior ** 2
    kl_ref = 0.5 * jnp.sum(sigma_r**2 / sp2 + mu_r**2 / sp2
                           - jnp.log(sigma_r**2 / sp2) - 1.0, axis=1)

    assert z.shape == (B, z_size) and kl.shape == (B,)
    assert jnp.allclose(z, z_ref, atol=5e-3, rtol=5e-3), \
        float(jnp.max(jnp.abs(z - z_ref)))
    assert jnp.allclose(kl, kl_ref, atol=5e-2, rtol=5e-3), \
        float(jnp.max(jnp.abs(kl - kl_ref)))
    print("KERNEL_OK")
</pallas_src>

<mosaic_0001>
module attributes {stable_mosaic.version = 11 : i64} {
  func.func @_vae_kernel(%arg0: i32, %arg1: memref<128x256xbf16, #tpu.memory_space<vmem>>, %arg2: memref<256x128xbf16, #tpu.memory_space<vmem>>, %arg3: memref<1x128xf32, #tpu.memory_space<vmem>>, %arg4: memref<128x256xbf16, #tpu.memory_space<vmem>>, %arg5: memref<1x256xf32, #tpu.memory_space<vmem>>, %arg6: memref<128x128xf32, #tpu.memory_space<vmem>>, %arg7: memref<128x128xf32, #tpu.memory_space<vmem>>, %arg8: memref<128x128xf32, #tpu.memory_space<vmem>>) attributes {dimension_semantics = [#tpu.dimension_semantics<parallel>], iteration_bounds = array<i64: 2>, scalar_prefetch = 0 : i64, scratch_operands = 0 : i64, tpu.core_type = #tpu.core_type<tc>, window_params = [{transform_indices = @transform_0, window_bounds = array<i64: 128, 256>}, {pipeline_mode = #tpu.pipeline_mode<synchronous>, transform_indices = @transform_1, window_bounds = array<i64: 256, 128>}, {pipeline_mode = #tpu.pipeline_mode<synchronous>, transform_indices = @transform_2, window_bounds = array<i64: 1, 128>}, {pipeline_mode = #tpu.pipeline_mode<synchronous>, transform_indices = @transform_3, window_bounds = array<i64: 128, 256>}, {pipeline_mode = #tpu.pipeline_mode<synchronous>, transform_indices = @transform_4, window_bounds = array<i64: 1, 256>}, {transform_indices = @transform_5, window_bounds = array<i64: 128, 128>}, {transform_indices = @transform_6, window_bounds = array<i64: 128, 128>}, {transform_indices = @transform_7, window_bounds = array<i64: 128, 128>}]} {
    %c0 = arith.constant 0 : index
    %c0_0 = arith.constant 0 : index
    %0 = vector.load %arg1[%c0, %c0_0] : memref<128x256xbf16, #tpu.memory_space<vmem>>, vector<128x256xbf16>
    %c0_1 = arith.constant 0 : index
    %c0_2 = arith.constant 0 : index
    %1 = vector.load %arg2[%c0_1, %c0_2] : memref<256x128xbf16, #tpu.memory_space<vmem>>, vector<256x128xbf16>
    %cst = arith.constant dense<0.000000e+00> : vector<128x128xf32>
    %2 = tpu.matmul %0, %1, %cst {dimension_numbers = #tpu.dot_dimension_numbers<[1], [0], [0], [1], [0, 0, 1, 1], [], []>} : vector<128x256xbf16>, vector<256x128xbf16>, vector<128x128xf32> -> vector<128x128xf32>
    %c0_3 = arith.constant 0 : index
    %c0_4 = arith.constant 0 : index
    %3 = vector.load %arg3[%c0_3, %c0_4] : memref<1x128xf32, #tpu.memory_space<vmem>>, vector<1x128xf32>
    %4 = vector.broadcast %3 : vector<1x128xf32> to vector<128x128xf32>
    %5 = arith.addf %2, %4 : vector<128x128xf32>
    %cst_5 = arith.constant 0.000000e+00 : f32
    %6 = vector.broadcast %cst_5 : f32 to vector<128x128xf32>
    %7 = arith.maximumf %5, %6 : vector<128x128xf32>
    %8 = arith.truncf %7 : vector<128x128xf32> to vector<128x128xbf16>
    %c0_6 = arith.constant 0 : index
    %c0_7 = arith.constant 0 : index
    %9 = vector.load %arg4[%c0_6, %c0_7] : memref<128x256xbf16, #tpu.memory_space<vmem>>, vector<128x256xbf16>
    %cst_8 = arith.constant dense<0.000000e+00> : vector<128x256xf32>
    %10 = tpu.matmul %8, %9, %cst_8 {dimension_numbers = #tpu.dot_dimension_numbers<[1], [0], [0], [1], [0, 0, 1, 1], [], []>} : vector<128x128xbf16>, vector<128x256xbf16>, vector<128x256xf32> -> vector<128x256xf32>
    %c0_9 = arith.constant 0 : index
    %c0_10 = arith.constant 0 : index
    %11 = vector.load %arg5[%c0_9, %c0_10] : memref<1x256xf32, #tpu.memory_space<vmem>>, vector<1x256xf32>
    %12 = vector.broadcast %11 : vector<1x256xf32> to vector<128x256xf32>
    %13 = arith.addf %10, %12 : vector<128x256xf32>
    %14 = vector.extract_strided_slice %13 {offsets = [0, 0], sizes = [128, 128], strides = [1, 1]} : vector<128x256xf32> to vector<128x128xf32>
    %15 = vector.extract_strided_slice %13 {offsets = [0, 128], sizes = [128, 128], strides = [1, 1]} : vector<128x256xf32> to vector<128x128xf32>
    %16 = math.exp %15 : vector<128x128xf32>
    %c0_11 = arith.constant 0 : index
    %c0_12 = arith.constant 0 : index
    %17 = vector.load %arg6[%c0_11, %c0_12] : memref<128x128xf32, #tpu.memory_space<vmem>>, vector<128x128xf32>
    %18 = arith.mulf %16, %17 : vector<128x128xf32>
    %19 = arith.addf %14, %18 : vector<128x128xf32>
    %c0_13 = arith.constant 0 : index
    %c0_14 = arith.constant 0 : index
    %20 = vector.load %arg7[%c0_13, %c0_14] : memref<128x128xf32, #tpu.memory_space<vmem>>, vector<128x128xf32>
    tpu.vector_store %arg7[%c0_13, %c0_14], %19 {strides = array<i32>} : memref<128x128xf32, #tpu.memory_space<vmem>>, vector<128x128xf32>,
    %21 = arith.mulf %16, %16 : vector<128x128xf32>
    %22 = arith.mulf %14, %14 : vector<128x128xf32>
    %23 = arith.addf %21, %22 : vector<128x128xf32>
    %cst_15 = arith.constant 5.917160e-01 : f32
    %24 = vector.broadcast %cst_15 : f32 to vector<128x128xf32>
    %25 = arith.mulf %23, %24 : vector<128x128xf32>
    %cst_16 = arith.constant 2.000000e+00 : f32
    %26 = vector.broadcast %cst_16 : f32 to vector<128x128xf32>
    %27 = arith.mulf %26, %15 : vector<128x128xf32>
    %28 = arith.subf %25, %27 : vector<128x128xf32>
    %cst_17 = arith.constant -0.475271463 : f32
    %29 = vector.broadcast %cst_17 : f32 to vector<128x128xf32>
    %30 = arith.addf %28, %29 : vector<128x128xf32>
    %cst_18 = arith.constant dense<0.000000e+00> : vector<128xf32>
    %31 = vector.multi_reduction <add>, %30, %cst_18 [1] : vector<128x128xf32> to vector<128xf32>
    %32 = vector.shape_cast %31 : vector<128xf32> to vector<128x1xf32>
    %cst_19 = arith.constant 5.000000e-01 : f32
    %33 = vector.broadcast %cst_19 : f32 to vector<128x1xf32>
    %34 = arith.mulf %33, %32 : vector<128x1xf32>
    %35 = vector.shape_cast %34 : vector<128x1xf32> to vector<128x1xf32>
    %36 = vector.broadcast %35 : vector<128x1xf32> to vector<128x128xf32>
    %c0_20 = arith.constant 0 : index
    %c0_21 = arith.constant 0 : index
    %37 = vector.load %arg8[%c0_20, %c0_21] : memref<128x128xf32, #tpu.memory_space<vmem>>, vector<128x128xf32>
    tpu.vector_store %arg8[%c0_20, %c0_21], %36 {strides = array<i32>} : memref<128x128xf32, #tpu.memory_space<vmem>>, vector<128x128xf32>,
    return
  }
  func.func @transform_0(%arg0: i32) -> (i32, i32) {
    %c0_i32 = arith.constant 0 : i32
    %c0_i32_0 = arith.constant 0 : i32
    return %arg0, %c0_i32 : i32, i32
  }
  func.func @transform_1(%arg0: i32) -> (i32, i32) {
    %c0_i32 = arith.constant 0 : i32
    %c0_i32_0 = arith.constant 0 : i32
    %c0_i32_1 = arith.constant 0 : i32
    return %c0_i32, %c0_i32_0 : i32, i32
  }
  func.func @transform_2(%arg0: i32) -> (i32, i32) {
    %c0_i32 = arith.constant 0 : i32
    %c0_i32_0 = arith.constant 0 : i32
    %c0_i32_1 = arith.constant 0 : i32
    return %c0_i32, %c0_i32_0 : i32, i32
  }
  func.func @transform_3(%arg0: i32) -> (i32, i32) {
    %c0_i32 = arith.constant 0 : i32
    %c0_i32_0 = arith.constant 0 : i32
    %c0_i32_1 = arith.constant 0 : i32
    return %c0_i32, %c0_i32_0 : i32, i32
  }
  func.func @transform_4(%arg0: i32) -> (i32, i32) {
    %c0_i32 = arith.constant 0 : i32
    %c0_i32_0 = arith.constant 0 : i32
    %c0_i32_1 = arith.constant 0 : i32
    return %c0_i32, %c0_i32_0 : i32, i32
  }
  func.func @transform_5(%arg0: i32) -> (i32, i32) {
    %c0_i32 = arith.constant 0 : i32
    %c0_i32_0 = arith.constant 0 : i32
    return %arg0, %c0_i32 : i32, i32
  }
  func.func @transform_6(%arg0: i32) -> (i32, i32) {
    %c0_i32 = arith.constant 0 : i32
    %c0_i32_0 = arith.constant 0 : i32
    return %arg0, %c0_i32 : i32, i32
  }
  func.func @transform_7(%arg0: i32) -> (i32, i32) {
    %c0_i32 = arith.constant 0 : i32
    %c0_i32_0 = arith.constant 0 : i32
    return %arg0, %c0_i32 : i32, i32
  }
}

</mosaic_0001>

<bundles_post_ra>
// kernel: tpu_custom_call.1
= control target key start
LH: loop header
LB: loop body
LE: loop exit
PB: predicated region body
PF: predicated region fallthrough
CT: control target
= control target key end

     0   :  { %s2569_s0 = inlined_call_operand.hbm [shape: bf16[256,256], index: 0, kind: input, shape index: {}]   ;;  %s2570_s1 = inlined_call_operand.hbm [shape: bf16[256,128], index: 1, kind: input, shape index: {}]   ;;  %s2571_s2 = inlined_call_operand.vmem [shape: f32[1,128], index: 2, kind: input, shape index: {}]   ;;  %s2572_s3 = inlined_call_operand.hbm [shape: bf16[128,256], index: 3, kind: input, shape index: {}]   ;;  %s2573_s4 = inlined_call_operand.vmem [shape: f32[1,256], index: 4, kind: input, shape index: {}]   ;;  %s2574_s5 = inlined_call_operand.hbm [shape: f32[256,128], index: 5, kind: input, shape index: {}]   ;;  %s2575_s6 = inlined_call_operand.hbm [shape: f32[256,128], index: 6, kind: output, shape index: {0}]   ;;  %s2576_s7 = inlined_call_operand.hbm [shape: f32[256,128], index: 7, kind: output, shape index: {1}]  }
   0x1   :  { %2588 = sst [smem:[#allocation21_spill]] %s2569_s0 }
   0x2   :  { %2589 = sst [smem:[#allocation22_spill]] %s2570_s1 }
   0x3   :  { %2590 = sst [smem:[#allocation23_spill]] %s2572_s3 }
   0x4   :  { %13 = vsyncpa [#allocation3], 0 }
   0x5   :  { %15 = vsyncpa [#allocation3 + $0x1], 0 }
   0x6   :  { %16 = vsyncpa [#allocation6], 0 }
   0x7   :  { %17 = vsyncpa [#allocation9], 0 }
   0x8   :  { %19 = vsyncpa [#allocation9 + $0x1], 0 }
   0x9   :  { %20 = vsyncpa [#allocation4], 0 }
   0xa   :  { %22 = vsyncpa [#allocation4 + $0x1], 0 }
   0xb   :  { %23 = vsyncpa [#allocation12], 0 }
   0xc   :  { %25 = vsyncpa [#allocation12 + $0x1], 0  ;;  %s2012_s24 = smov 0   ;;  %s2014_s25 = smov 0  }
   0xd   :  { %s2016_s26 = smov 0   ;;  %s2018_s27 = smov 0  }
   0xe LB: > { %2591 = sst [smem:[#allocation18_spill]] %s1953_s26  ;;  %s2033_s28 = sadd.s32 4294967295, %s1957_s27   ;;  %s1957_s27 = sphi %s2018_s27, %s2613_s27   ;;  %s1953_s26 = sphi %s2016_s26, %s2615_s26   ;;  %s1949_s25 = sphi %s2014_s25, %s2617_s25   ;;  %s1945_s24 = sphi %s2012_s24, %s2616_s24  }
   0xf   : > { %s1410_s29 = sadd.s32 4294967294, %s1957_s27   ;;  %p51_p0 = scmp.ne.s32.totalorder %s1949_s25, %s1945_s24 }
  0x10   : > { %p2577_p1 = scmp.eq.s32.totalorder %s2033_s28, 0  ;;  %p191_p3 = scmp.eq.s32.totalorder %s1410_s29, 1 }
  0x11   : > { %p1411_p5 = scmp.ge.s32.totalorder %s1957_s27, 1  ;;  %p224_p7 = scmp.lt.s32.totalorder %s1957_s27, 3 }
  0x12   : > { %p2042_p4 = por %p2577_p1, %p51_p0  ;;  %p2047_p6 = por %p191_p3, %p51_p0 }
  0x13   : > { %p2052_p8 = pnand %p1411_p5, %p224_p7  ;;  %s1959_s10 = smov [#allocation5]  }
  0x14   : > { %s2592_s30 = scalar_select %p2042_p4, 1, 0 }
  0x15   : > { %s2593_s8 = scalar_select %p2047_p6, 1, 0 }
  0x16   : > { %s236_s11 = sshll.u32 %s1959_s10, 4  ;;  %p1571_p9 = pneg %p2052_p8  ;;  %s2056_s11 = int_to_ptr.vmem [resolvable:$true] %s236_s11 }
  0x17   : > { %s1960_s13 = smov [#allocation7]   ;;  %s2596_s1 = sld [smem:[#allocation22_spill]] }
  0x18   : > { %p2063_p11 = pnand %p1571_p9, %p2577_p1  ;;  %s252_s14 = sshll.u32 %s1960_s13, 4  ;;  %s2067_s14 = int_to_ptr.vmem [resolvable:$true] %s252_s14 }
  0x1a   : > { %p1737_p13 = pneg %p2063_p11 }
  0x1d   : > { %s1735_s17 = scalar_lea.hbm %s2596_s1, 2048 }
  0x1e   : > { %p1736_p12 = scmp.ne.s32.totalorder %s2596_s1, %s1735_s17  ;;  %p1742_p5 = scmp.lt.u32.totalorder %s1735_s17, %s2596_s1 }
  0x20   : > { %p1738_p0 = pnand %p1737_p13, %p1736_p12 }
  0x22   : > { %p1739_p3 = pneg %p1738_p0 }
  0x24   : > { %p1744_p7 = pnand %p1742_p5, %p1739_p3 }
  0x26   : > { %1747 = shalt.err (!%p1744_p7)
}
  0x27   : > { %s1748_s22 = scalar_lea.vmem %s2056_s11, 2048  ;;  %p1756_p2 = scmp.lt.s32.totalorder %s2056_s11, %s2056_s11 }
  0x28   : > { %p1749_p9 = scmp.ne.s32.totalorder %s2056_s11, %s1748_s22  ;;  %p1757_p12 = scmp.lt.s32.totalorder %s1748_s22, %s1748_s22 }
  0x2a   : > { %p1751_p10 = pnand %p1749_p9, %p1737_p13  ;;  %p1758_p0 = por %p1757_p12, %p1756_p2 }
  0x2c   : > { %p1752_p1 = pneg %p1751_p10 }
  0x2e   : > { %p1759_p6 = pnand %p1758_p0, %p1752_p1 }
  0x30   : > { %1762 = shalt.err (!%p1759_p6)
}
  0x31   : > { %s1961_s23 = smov 64   ;;  %s1962_s29 = smov 4  }
  0x32   : > { %1574 = dma.hbm_to_vmem [thread:$0]  (!%p2063_p11), %s2596_s1, 2048, %s2056_s11, [#allocation6], %s1961_s23, %s1961_s23, %s1962_s29  }
  0x33   : > { %s2597_s3 = sld [smem:[#allocation23_spill]] }
  0x39   : > { %s1763_s17 = scalar_lea.hbm %s2597_s3, 2048 }
  0x3a   : > { %p1764_p2 = scmp.ne.s32.totalorder %s2597_s3, %s1763_s17  ;;  %p1770_p10 = scmp.lt.u32.totalorder %s1763_s17, %s2597_s3 }
  0x3c   : > { %p1766_p1 = pnand %p1764_p2, %p1737_p13 }
  0x3e   : > { %p1767_p6 = pneg %p1766_p1 }
  0x40   : > { %p1772_p3 = pnand %p1770_p10, %p1767_p6 }
  0x42   : > { %1775 = shalt.err (!%p1772_p3)
}
  0x43   : > { %s1776_s11 = scalar_lea.vmem %s2067_s14, 2048  ;;  %p1784_p12 = scmp.lt.s32.totalorder %s2067_s14, %s2067_s14 }
  0x44   : > { %p1777_p5 = scmp.ne.s32.totalorder %s2067_s14, %s1776_s11  ;;  %p1785_p0 = scmp.lt.s32.totalorder %s1776_s11, %s1776_s11 }
  0x46   : > { %p1779_p7 = pnand %p1777_p5, %p1737_p13  ;;  %p1786_p2 = por %p1785_p0, %p1784_p12 }
  0x48   : > { %p1780_p9 = pneg %p1779_p7 }
  0x4a   : > { %p1787_p1 = pnand %p1786_p2, %p1780_p9 }
  0x4c   : > { %1790 = shalt.err (!%p1787_p1)
}
  0x4d   : > { %s2578_s22 = smov 128   ;;  %s2580_s23 = smov 8  }
  0x4e   : > { %1577 = dma.hbm_to_vmem [thread:$0]  (!%p2063_p11), %s2597_s3, 2048, %s2067_s14, [#allocation6], %s2578_s22, %s2578_s22, %s2580_s23  }
  0x4f   : > { %s2125_s13 = sadd.s32 1, %s1957_s27   ;;  %s38_s16 = sadd.s32 1, %s1953_s26 }
  0x50   : > { %2598 = sst [smem:[#allocation19_spill]] %s2125_s13  ;;  %s35_s15 = ssub.s32 %s1957_s27, %s2125_s13 }
  0x51   : > { %p36_p13 = scmp.eq.s32.totalorder %s35_s15, 0  ;;  %p45_p6 = scmp.ne.s32.totalorder %s1953_s26, %s1949_s25 }
  0x52   : > { %p46_p10 = scmp.eq.s32.totalorder %s1957_s27, 0  ;;  %p2600_p5 = scmp.eq.s32.totalorder %s2033_s28, 1 }
  0x53   : > { %s2134_s17 = scalar_select %p36_p13, %s1953_s26, %s38_s16  }
  0x54   : > { %p47_p3 = por %p46_p10, %p45_p6  ;;  %p2138_p7 = por %p2600_p5, %p45_p6 }
  0x55   : > { %2599 = sst [smem:[#allocation20_spill]] %s2134_s17  ;;  %p1594_p9 = scmp.lt.s32.totalorder %s1957_s27, 2 }
  0x56   : > { %s2601_s12 = scalar_select %p2138_p7, 1, 0 }
  0x57   : > { %s2144_s18 = sand.u32 1, %s1953_s26   ;;  %s1487_s19 = sshll.u32 %s1957_s27, 11 }
  0x58   : > { %s2582_s14 = sshll.u32 %s2144_s18, 7  ;;  %s2602_s0 = sld [smem:[#allocation21_spill]] }
  0x59   : > { %s273_s29 = scalar_lea.vmem [#allocation2], %s2582_s14  ;;  %p2157_p11 = pnand %p1594_p9, %p47_p3 }
  0x5a   : > { %s281_s10 = sshll.u32 %s273_s29, 4  ;;  %s2164_s20 = scalar_lea.hbm %s2574_s5, %s1487_s19  ;;  %s2155_s10 = int_to_ptr.vmem [resolvable:$true] %s281_s10 }
  0x5b   : > { %s270_s21 = scalar_lea.sflag [#allocation3], %s2144_s18  ;;  %p1793_p0 = pneg %p2157_p11 }
  0x5e   : > { %s2151_s11 = scalar_lea.hbm %s2602_s0, %s1487_s19  ;;  %s1796_s1 = scalar_lea.hbm %s2602_s0, 4096 }
  0x5f   : > { %s1791_s23 = scalar_lea.hbm %s2151_s11, 2048  ;;  %p1797_p13 = scmp.lt.u32.totalorder %s2151_s11, %s2602_s0 }
  0x60   : > { %p1792_p12 = scmp.ne.s32.totalorder %s2151_s11, %s1791_s23  ;;  %p1798_p6 = scmp.lt.u32.totalorder %s1796_s1, %s1791_s23 }
  0x61   : > { %p1800_p3 = scmp.lt.u32.totalorder %s1791_s23, %s2151_s11 }
  0x62   : > { %p1794_p2 = pnand %p1793_p0, %p1792_p12  ;;  %p1799_p10 = por %p1798_p6, %p1797_p13 }
  0x64   : > { %p1795_p1 = pneg %p1794_p2  ;;  %p1801_p5 = por %p1800_p3, %p1799_p10 }
  0x66   : > { %p1802_p9 = pnand %p1801_p5, %p1795_p1 }
  0x68   : > { %1805 = shalt.err (!%p1802_p9)
}
  0x69   : > { %s1806_s22 = scalar_lea.vmem %s2155_s10, 2048  ;;  %s1965_s14 = smov [#allocation2]  }
  0x6a   : > { %p1807_p12 = scmp.ne.s32.totalorder %s2155_s10, %s1806_s22  ;;  %s1811_s19 = sshll.u32 %s1965_s14, 4  ;;  %s1812_s19 = int_to_ptr.vmem [resolvable:$false] %s1811_s19 }
  0x6b   : > { %s1813_s3 = scalar_lea.vmem %s1812_s19, 4096  ;;  %p1814_p4 = scmp.lt.s32.totalorder %s2155_s10, %s1812_s19 }
  0x6c   : > { %p1809_p2 = pnand %p1807_p12, %p1793_p0  ;;  %p1815_p13 = scmp.lt.s32.totalorder %s1813_s3, %s1806_s22 }
  0x6e   : > { %p1810_p7 = pneg %p1809_p2  ;;  %p1816_p6 = por %p1815_p13, %p1814_p4 }
  0x70   : > { %p1817_p10 = pnand %p1816_p6, %p1810_p7 }
  0x72   : > { %1820 = shalt.err (!%p1817_p10)
}
  0x73   : > { %s2604_s1 = smov 8   ;;  %s2605_s23 = smov 128  }
  0x74   : > { %1581 = dma.hbm_to_vmem [thread:$0]  (!%p2157_p11), %s2151_s11, 2048, %s2155_s10, %s270_s21, %s2605_s23, %s2605_s23, %s2604_s1  }
  0x75   : > { %s2606_s17 = sshll.u32 %s2144_s18, 7  ;;  %s292_s22 = scalar_lea.sflag [#allocation9], %s2144_s18 }
  0x76   : > { %s295_s16 = scalar_lea.vmem [#allocation8], %s2606_s17  ;;  %s1821_s14 = scalar_lea.hbm %s2164_s20, 2048 }
  0x77   : > { %s302_s29 = sshll.u32 %s295_s16, 4  ;;  %p1822_p4 = scmp.ne.s32.totalorder %s2164_s20, %s1821_s14  ;;  %s2199_s29 = int_to_ptr.vmem [resolvable:$true] %s302_s29 }
  0x78   : > { %s1826_s0 = scalar_lea.hbm %s2574_s5, 4096  ;;  %p1827_p3 = scmp.lt.u32.totalorder %s2164_s20, %s2574_s5 }
  0x79   : > { %p1824_p7 = pnand %p1822_p4, %p1793_p0  ;;  %p1828_p5 = scmp.lt.u32.totalorder %s1826_s0, %s1821_s14 }
  0x7a   : > { %p1830_p12 = scmp.lt.u32.totalorder %s1821_s14, %s2164_s20 }
  0x7b   : > { %p1825_p1 = pneg %p1824_p7  ;;  %p1829_p9 = por %p1828_p5, %p1827_p3 }
  0x7d   : > { %p1831_p2 = por %p1830_p12, %p1829_p9 }
  0x7f   : > { %p1832_p13 = pnand %p1831_p2, %p1825_p1 }
  0x81   : > { %1835 = shalt.err (!%p1832_p13)
}
  0x82   : > { %s1836_s11 = scalar_lea.vmem %s2199_s29, 2048  ;;  %s1966_s10 = smov [#allocation8]  }
  0x83   : > { %p1837_p6 = scmp.ne.s32.totalorder %s2199_s29, %s1836_s11  ;;  %s1841_s21 = sshll.u32 %s1966_s10, 4  ;;  %s1842_s21 = int_to_ptr.vmem [resolvable:$false] %s1841_s21 }
  0x84   : > { %s1843_s26 = scalar_lea.vmem %s1842_s21, 4096  ;;  %p1844_p7 = scmp.lt.s32.totalorder %s2199_s29, %s1842_s21 }
  0x85   : > { %p1839_p10 = pnand %p1837_p6, %p1793_p0  ;;  %p1845_p3 = scmp.lt.s32.totalorder %s1843_s26, %s1836_s11 }
  0x87   : > { %p1840_p4 = pneg %p1839_p10  ;;  %p1846_p5 = por %p1845_p3, %p1844_p7 }
  0x89   : > { %p1847_p9 = pnand %p1846_p5, %p1840_p4 }
  0x8b   : > { %1850 = shalt.err (!%p1847_p9)
}
  0x8c   : > { %1584 = dma.hbm_to_vmem [thread:$0]  (!%p2157_p11), %s2164_s20, 2048, %s2199_s29, %s292_s22, %s2605_s23, %s2605_s23, %s2604_s1  }
  0x8d   : > { %314 = sbr.rel (%p2052_p8) target bundleno = 865 (0x361), region = 44  ;;  %s2233_s0 = sand.u32 (!%p2052_p8), 1, %s1949_s25  }
  0x8e   : > { %s2236_s13 = sshll.u32 (!%p2052_p8), %s2233_s0, 7  ;;  %s317_s15 = scalar_lea.sflag (!%p2052_p8), [#allocation3], %s2233_s0 }
  0x8f   : > { %s2240_s17 = scalar_lea.vmem (!%p2052_p8), [#allocation2], %s2236_s13  ;;  %p2607_p0 = scmp.ne.s32.totalorder (!%p2052_p8), %s2592_s30, 0 }
  0x94   : > { %1924 = dma.done.wait (%p2607_p0), %s317_s15, 2048  }
  0x95   : > { %1926 = vsyncadd (%p2607_p0), %s317_s15, 4294965248  ;;  %p2608_p11 = scmp.eq.s32.totalorder %s2033_s28, 0 }
  0x97   : > { %1928 = dma.done.wait (%p2608_p11), [#allocation6], 4096   ;;  %p2609_p8 = pmov %p2608_p11 }
  0x98   : > { %s334_s9 = scalar_lea.sflag [#allocation9], %s2233_s0  ;;  %s2252_s18 = scalar_lea.vmem [#allocation8], %s2236_s13 }
  0x99   : > { %1930 = vsyncadd (%p2609_p8), [#allocation6], 4294963200 }
  0x9a   : > { %1932 = dma.done.wait (%p2607_p0), %s334_s9, 2048  }
  0x9b   : > { %1934 = vsyncadd (%p2607_p0), %s334_s9, 4294965248  ;;  %v1639_v0 = vld [vmem:[#allocation5 + $0x40] sm:$0xff]   ;;  %v1641_v2 = vld [vmem:[#allocation5 + $0x48] sm:$0xff]   ;;  %v1967_v48 = vmov 0   ;;  %s2334_s16 = scalar_lea.vmem [#allocation10], %s2236_s13  ;;  %s1489_s29 = sshll.u32 %s2033_s28, 11 }
  0x9c   : > { %v1640_v1 = vld [vmem:[#allocation5] sm:$0xff]   ;;  %1491 = vmatprep.subr.bf16.mxu0 %v1639_v0  ;;  %v1642_v3 = vld [vmem:[#allocation5 + $0x8] sm:$0xff]   ;;  %v1643_v4 = vld [vmem:[#allocation5 + $0x50] sm:$0xff]   ;;  %875 = vmatprep.mubr.bf16.mxu1 %v1967_v48  ;;  %s2463_s19 = scalar_lea.hbm %s2575_s6, %s1489_s29  ;;  %s1247_s3 = sshll.u32 %s2334_s16, 4  ;;  %s2466_s3 = int_to_ptr.vmem [resolvable:$true] %s1247_s3 }
  0x9d   : > { %1492 = vmatpush3.bf16.msra.mxu0 %v1640_v1  ;;  %v1644_v5 = vld [vmem:[#allocation5 + $0x10] sm:$0xff]   ;;  %v1645_v6 = vld [vmem:[#allocation5 + $0x58] sm:$0xff]   ;;  %v1647_v8 = vld [vmem:[#allocation5 + $0x60] sm:$0xff]   ;;  %s1229_s11 = scalar_lea.sflag [#allocation4], %s2233_s0  ;;  %s1851_s10 = scalar_lea.vmem %s2466_s3, 2048 }
  0x9e   : > { %1493 = vmatprep.subr.bf16.mxu0 %v1641_v2  ;;  %v1646_v7 = vld [vmem:[#allocation5 + $0x18] sm:$0xff]   ;;  %v1648_v9 = vld [vmem:[#allocation5 + $0x20] sm:$0xff]   ;;  %v1649_v10 = vld [vmem:[#allocation5 + $0x68] sm:$0xff]   ;;  %p1852_p1 = scmp.ne.s32.totalorder %s2466_s3, %s1851_s10  ;;  %p2610_p12 = scmp.ne.s32.totalorder %s2601_s12, 0 }
  0x9f   : > { %v1657_v11 = vld [vmem:[%s2240_s17 + $0x4] ss:$8 sps:$4 sm:$0xff]   ;;  %v1651_v13 = vld [vmem:[#allocation5 + $0x70] sm:$0xff]   ;;  %v1653_v15 = vld [vmem:[#allocation5 + $0x78] sm:$0xff]   ;;  %s1968_s21 = smov [#allocation10]  }
  0xa0   : > { %v1650_v12 = vld [vmem:[#allocation5 + $0x28] sm:$0xff]   ;;  %646 = vmatprep.mubr.bf16.mxu0 %v1657_v11  ;;  %v1652_v14 = vld [vmem:[#allocation5 + $0x30] sm:$0xff]   ;;  %v1654_v16 = vld [vmem:[#allocation5 + $0x38] sm:$0xff]   ;;  %p1853_p2 = pnand %p1852_p1, %p2610_p12  ;;  %s1855_s26 = sshll.u32 %s1968_s21, 4  ;;  %s1856_s26 = int_to_ptr.vmem [resolvable:$false] %s1855_s26 }
  0xa1   : > { %1494 = vmatpush3.bf16.msra.mxu0 %v1642_v3  ;;  %v1679_v17 = vld [vmem:[#allocation7 + $0x4] ss:$8 sps:$4 sm:$0xff]   ;;  %v1681_v18 = vld [vmem:[#allocation7] ss:$8 sps:$4 sm:$0xff]   ;;  %v1682_v19 = vld [vmem:[#allocation7 + $0x14] ss:$8 sps:$4 sm:$0xff]   ;;  %p1858_p6 = scmp.lt.s32.totalorder %s2466_s3, %s1856_s26 }
  0xa2   : > { %1495 = vmatprep.subr.bf16.mxu0 %v1643_v4  ;;  %843 = vmatprep.subr.bf16.mxu1 %v1679_v17  ;;  %v1655_v20 = vld [vmem:[%s2240_s17] ss:$8 sps:$4 sm:$0xff]   ;;  %v1684_v21 = vld [vmem:[#allocation7 + $0x10] ss:$8 sps:$4 sm:$0xff]   ;;  %v1658_v22 = vld [vmem:[%s2240_s17 + $0x14] ss:$8 sps:$4 sm:$0xff]   ;;  %p1854_p13 = pneg %p1853_p2 }
  0xa3   : > { %844 = vmatpush1.bf16.msra.mxu1 %v1681_v18  ;;  %v1685_v23 = vld [vmem:[#allocation7 + $0x24] ss:$8 sps:$4 sm:$0xff]   ;;  %v1687_v24 = vld [vmem:[#allocation7 + $0x20] ss:$8 sps:$4 sm:$0xff]   ;;  %v1688_v25 = vld [vmem:[#allocation7 + $0x34] ss:$8 sps:$4 sm:$0xff]  }
  0xa4   : > { %845 = vmatprep.subr.bf16.mxu1 %v1682_v19  ;;  %v1660_v26 = vld [vmem:[%s2240_s17 + $0x10] ss:$8 sps:$4 sm:$0xff]   ;;  %v1661_v28 = vld [vmem:[%s2240_s17 + $0x24] ss:$8 sps:$4 sm:$0xff]   ;;  %v1693_v30 = vld [vmem:[#allocation7 + $0x40] ss:$8 sps:$4 sm:$0xff]  }
  0xa5   : > { %1496 = vmatpush3.bf16.msra.mxu0 %v1644_v5  ;;  %v1690_v27 = vld [vmem:[#allocation7 + $0x30] ss:$8 sps:$4 sm:$0xff]   ;;  %v1691_v29 = vld [vmem:[#allocation7 + $0x44] ss:$8 sps:$4 sm:$0xff]   ;;  %v1663_v31 = vld [vmem:[%s2240_s17 + $0x20] ss:$8 sps:$4 sm:$0xff]  }
  0xa6   : > { %1497 = vmatprep.subr.bf16.mxu0 %v1645_v6  ;;  %v1664_v32 = vld [vmem:[%s2240_s17 + $0x34] ss:$8 sps:$4 sm:$0xff]   ;;  %v1666_v33 = vld [vmem:[%s2240_s17 + $0x30] ss:$8 sps:$4 sm:$0xff]   ;;  %v1667_v34 = vld [vmem:[%s2240_s17 + $0x44] ss:$8 sps:$4 sm:$0xff]  }
  0xa7   : > { %846 = vmatpush1.bf16.msra.mxu1 %v1684_v21  ;;  %v1669_v35 = vld [vmem:[%s2240_s17 + $0x40] ss:$8 sps:$4 sm:$0xff]   ;;  %v1670_v36 = vld [vmem:[%s2240_s17 + $0x54] ss:$8 sps:$4 sm:$0xff]   ;;  %v1672_v37 = vld [vmem:[%s2240_s17 + $0x50] ss:$8 sps:$4 sm:$0xff]  }
  0xa8   : > { %847 = vmatprep.subr.bf16.mxu1 %v1685_v23  ;;  %v1673_v38 = vld [vmem:[%s2240_s17 + $0x64] ss:$8 sps:$4 sm:$0xff]   ;;  %v1675_v39 = vld [vmem:[%s2240_s17 + $0x60] ss:$8 sps:$4 sm:$0xff]   ;;  %v1676_v40 = vld [vmem:[%s2240_s17 + $0x74] ss:$8 sps:$4 sm:$0xff]  }
  0xa9   : > { %1498 = vmatpush3.bf16.msra.mxu0 %v1646_v7  ;;  %v1678_v41 = vld [vmem:[%s2240_s17 + $0x70] ss:$8 sps:$4 sm:$0xff]   ;;  %v1694_v42 = vld [vmem:[#allocation7 + $0x54] ss:$8 sps:$4 sm:$0xff]   ;;  %v1697_v44 = vld [vmem:[#allocation7 + $0x64] ss:$8 sps:$4 sm:$0xff]  }
  0xaa   : > { %1499 = vmatprep.subr.bf16.mxu0 %v1647_v8  ;;  %v1696_v43 = vld [vmem:[#allocation7 + $0x50] ss:$8 sps:$4 sm:$0xff]   ;;  %v1699_v45 = vld [vmem:[#allocation7 + $0x60] ss:$8 sps:$4 sm:$0xff]   ;;  %v1700_v46 = vld [vmem:[#allocation7 + $0x74] ss:$8 sps:$4 sm:$0xff]  }
  0xab   : > { %848 = vmatpush1.bf16.msra.mxu1 %v1687_v24  ;;  %v1702_v47 = vld [vmem:[#allocation7 + $0x70] ss:$8 sps:$4 sm:$0xff]   ;;  %v2278_v50 = vld [vmem:[%s2571_s2] ss:$0 sm:$0xff]  ;;  %s1857_s15 = scalar_lea.vmem %s1856_s26, 4096 }
  0xac   : > { %849 = vmatprep.subr.bf16.mxu1 %v1688_v25  ;;  %p1859_p10 = scmp.lt.s32.totalorder %s1857_s15, %s1851_s10 }
  0xad   : > { %1500 = vmatpush3.bf16.msra.mxu0 %v1648_v9 }
  0xae   : > { %1501 = vmatprep.subr.bf16.mxu0 %v1649_v10  ;;  %p1860_p4 = por %p1859_p10, %p1858_p6 }
  0xaf   : > { %850 = vmatpush1.bf16.msra.mxu1 %v1690_v27 }
  0xb0   : > { %851 = vmatprep.subr.bf16.mxu1 %v1691_v29  ;;  %p1861_p7 = pnand %p1860_p4, %p1854_p13 }
  0xb1   : > { %1502 = vmatpush3.bf16.msra.mxu0 %v1650_v12 }
  0xb2   : > { %1503 = vmatprep.subr.bf16.mxu0 %v1651_v13 }
  0xb3   : > { %852 = vmatpush1.bf16.msra.mxu1 %v1693_v30 }
  0xb4   : > { %853 = vmatprep.subr.bf16.mxu1 %v1694_v42 }
  0xb5   : > { %1504 = vmatpush3.bf16.msra.mxu0 %v1652_v14 }
  0xb6   : > { %1505 = vmatprep.subr.bf16.mxu0 %v1653_v15 }
  0xb7   : > { %854 = vmatpush1.bf16.msra.mxu1 %v1696_v43 }
  0xb8   : > { %855 = vmatprep.subr.bf16.mxu1 %v1697_v44 }
  0xb9   : > { %1506 = vmatpush3.bf16.msra.mxu0 %v1654_v16 }
  0xbb   : > { %856 = vmatpush1.bf16.msra.mxu1 %v1699_v45 }
  0xbc   : > { %647 = vmatmul.mubr.bf16.vlgmr.msra.gmra.mrb[0].mxu0 %v1655_v20  ;;  %857 = vmatprep.subr.bf16.mxu1 %v1700_v46 }
  0xbd   : > { %654 = vmatprep.mubr.bf16.mxu0 %v1658_v22 }
  0xbf   : > { %858 = vmatpush1.bf16.msra.mxu1 %v1702_v47 }
  0xc4   : > { %655 = vmatmul.mubr.bf16.gmra.mrb[4].mxu0 %v1660_v26 }
  0xc5   : > { %662 = vmatprep.mubr.bf16.mxu0 %v1661_v28 }
  0xcc   : > { %663 = vmatmul.mubr.bf16.gmra.mrb[8].mxu0 %v1663_v31 }
  0xcd   : > { %670 = vmatprep.mubr.bf16.mxu0 %v1664_v32 }
  0xd4   : > { %671 = vmatmul.mubr.bf16.gmra.mrb[12].mxu0 %v1666_v33 }
  0xd5   : > { %678 = vmatprep.mubr.bf16.mxu0 %v1667_v34 }
  0xdc   : > { %679 = vmatmul.mubr.bf16.gmra.mrb[16].mxu0 %v1669_v35 }
  0xdd   : > { %686 = vmatprep.mubr.bf16.mxu0 %v1670_v36 }
  0xe4   : > { %687 = vmatmul.mubr.bf16.gmra.mrb[20].mxu0 %v1672_v37 }
  0xe5   : > { %694 = vmatprep.mubr.bf16.mxu0 %v1673_v38 }
  0xec   : > { %695 = vmatmul.mubr.bf16.gmra.mrb[24].mxu0 %v1675_v39 }
  0xed   : > { %702 = vmatprep.mubr.bf16.mxu0 %v1676_v40 }
  0xf4   : > { %703 = vmatmul.mubr.bf16.gmra.mrb[28].mxu0 %v1678_v41 }
 0x18f   : > { %v1507_v49 = vpop.f32.mrb[0].mxu0 }
 0x190   : > { %v1508_v51 = vpop.f32.mrb[1].mxu0 }
 0x191   : > { %v1509_v52 = vadd.f32 %v1508_v51, %v1507_v49  ;;  %v1510_v53 = vpop.f32.mrb[2].mxu0 }
 0x192   : > { %v1511_v54 = vpop.f32.mrb[3].mxu0 }
 0x193   : > { %v649_v55 = vadd.f32 %v1509_v52, %v2278_v50  ;;  %v1512_v56 = vadd.f32 %v1511_v54, %v1510_v53 }
 0x195   : > { %v652_v57 = vadd.f32 %v1512_v56, %v2278_v50  ;;  %v711_v58 = vmax.f32 %v649_v55, 0.0 }
 0x197   : > { %v712_v59 = vmax.f32 %v652_v57, 0.0  ;;  %v1513_v60 = vpop.f32.mrb[4].mxu0 }
 0x198   : > { %v1514_v61 = vpop.f32.mrb[5].mxu0 }
 0x199   : > { %v1515_v62 = vadd.f32 %v1514_v61, %v1513_v60  ;;  %v1516_v63 = vpop.f32.mrb[6].mxu0  ;;  %v727_v0 = vpack.c.bf16 %v712_v59, %v711_v58 }
 0x19a   : > { %v1517_v1 = vpop.f32.mrb[7].mxu0 }
 0x19b   : > { %v657_v2 = vadd.f32 %v1515_v62, %v2278_v50  ;;  %v1518_v3 = vadd.f32 %v1517_v1, %v1516_v63  ;;  %876 = vmatmul.mubr.bf16.vlgmr.msra.gmra.mrb[0].mxu1 %v727_v0 }
 0x19c   : > { %885 = vmatprep.mubr.bf16.mxu1 %v1967_v48 }
 0x19d   : > { %v660_v4 = vadd.f32 %v1518_v3, %v2278_v50  ;;  %v713_v5 = vmax.f32 %v657_v2, 0.0 }
 0x19f   : > { %v714_v6 = vmax.f32 %v660_v4, 0.0  ;;  %v1519_v7 = vpop.f32.mrb[8].mxu0 }
 0x1a0   : > { %v1520_v8 = vpop.f32.mrb[9].mxu0 }
 0x1a1   : > { %v1521_v9 = vadd.f32 %v1520_v8, %v1519_v7  ;;  %v1522_v10 = vpop.f32.mrb[10].mxu0  ;;  %v728_v11 = vpack.c.bf16 %v714_v6, %v713_v5 }
 0x1a2   : > { %v1523_v12 = vpop.f32.mrb[11].mxu0 }
 0x1a3   : > { %v665_v13 = vadd.f32 %v1521_v9, %v2278_v50  ;;  %v1524_v14 = vadd.f32 %v1523_v12, %v1522_v10  ;;  %886 = vmatmul.mubr.bf16.gmra.mrb[4].mxu1 %v728_v11  ;;  %v753_v12 = vlaneseq }
 0x1a4   : > { %895 = vmatprep.mubr.bf16.mxu1 %v1967_v48 }
 0x1a5   : > { %v668_v15 = vadd.f32 %v1524_v14, %v2278_v50  ;;  %v715_v16 = vmax.f32 %v665_v13, 0.0  ;;  %v754_v13 = vshrl.u32 %v753_v12, 7 }
 0x1a7   : > { %v716_v17 = vmax.f32 %v668_v15, 0.0  ;;  %v1525_v18 = vpop.f32.mrb[12].mxu0  ;;  %v759_v14 = vsub.s32 1, %v754_v13  ;;  %v751_v15 = vld [vmem:[%s2573_s4] sm:$0x3] }
 0x1a8   : > { %v1526_v19 = vpop.f32.mrb[13].mxu0 }
 0x1a9   : > { %v1527_v20 = vadd.f32 %v1526_v19, %v1525_v18  ;;  %v1528_v21 = vpop.f32.mrb[14].mxu0  ;;  %v729_v22 = vpack.c.bf16 %v716_v17, %v715_v16  ;;  %v2306_v16 = vrot.slane %v751_v15, %v759_v14 }
 0x1aa   : > { %v1529_v23 = vpop.f32.mrb[15].mxu0 }
 0x1ab   : > { %v673_v24 = vadd.f32 %v1527_v20, %v2278_v50  ;;  %v1530_v25 = vadd.f32 %v1529_v23, %v1528_v21  ;;  %896 = vmatmul.mubr.bf16.gmra.mrb[8].mxu1 %v729_v22  ;;  %v755_v22 = vsub.s32 0, %v754_v13 }
 0x1ac   : > { %905 = vmatprep.mubr.bf16.mxu1 %v1967_v48 }
 0x1ad   : > { %v676_v26 = vadd.f32 %v1530_v25, %v2278_v50  ;;  %v717_v27 = vmax.f32 %v673_v24, 0.0 }
 0x1af   : > { %v718_v28 = vmax.f32 %v676_v26, 0.0  ;;  %v1531_v29 = vpop.f32.mrb[16].mxu0  ;;  %v2310_v26 = vrot.slane %v751_v15, %v755_v22 }
 0x1b0   : > { %v1532_v30 = vpop.f32.mrb[17].mxu0 }
 0x1b1   : > { %v1533_v31 = vadd.f32 %v1532_v30, %v1531_v29  ;;  %v1534_v32 = vpop.f32.mrb[18].mxu0  ;;  %v730_v33 = vpack.c.bf16 %v718_v28, %v717_v27 }
 0x1b2   : > { %v1535_v34 = vpop.f32.mrb[19].mxu0 }
 0x1b3   : > { %v681_v35 = vadd.f32 %v1533_v31, %v2278_v50  ;;  %v1536_v36 = vadd.f32 %v1535_v34, %v1534_v32  ;;  %906 = vmatmul.mubr.bf16.gmra.mrb[12].mxu1 %v730_v33  ;;  %v988_v33 = vld [vmem:[%s2252_s18] sm:$0xff] }
 0x1b4   : > { %915 = vmatprep.mubr.bf16.mxu1 %v1967_v48 }
 0x1b5   : > { %v684_v37 = vadd.f32 %v1536_v36, %v2278_v50  ;;  %v719_v38 = vmax.f32 %v681_v35, 0.0  ;;  %v989_v36 = vld [vmem:[%s2252_s18 + $0x8] sm:$0xff] }
 0x1b7   : > { %v720_v39 = vmax.f32 %v684_v37, 0.0  ;;  %v1537_v40 = vpop.f32.mrb[20].mxu0 }
 0x1b8   : > { %v1538_v41 = vpop.f32.mrb[21].mxu0 }
 0x1b9   : > { %v1539_v42 = vadd.f32 %v1538_v41, %v1537_v40  ;;  %v1540_v43 = vpop.f32.mrb[22].mxu0  ;;  %v731_v44 = vpack.c.bf16 %v720_v39, %v719_v38 }
 0x1ba   : > { %v1541_v45 = vpop.f32.mrb[23].mxu0 }
 0x1bb   : > { %v689_v46 = vadd.f32 %v1539_v42, %v2278_v50  ;;  %v1542_v47 = vadd.f32 %v1541_v45, %v1540_v43  ;;  %916 = vmatmul.mubr.bf16.gmra.mrb[16].mxu1 %v731_v44 }
 0x1bc   : > { %925 = vmatprep.mubr.bf16.mxu1 %v1967_v48 }
 0x1bd   : > { %v692_v49 = vadd.f32 %v1542_v47, %v2278_v50  ;;  %v721_v51 = vmax.f32 %v689_v46, 0.0 }
 0x1bf   : > { %v722_v52 = vmax.f32 %v692_v49, 0.0  ;;  %v1543_v53 = vpop.f32.mrb[24].mxu0 }
 0x1c0   : > { %v1544_v54 = vpop.f32.mrb[25].mxu0 }
 0x1c1   : > { %v1545_v55 = vadd.f32 %v1544_v54, %v1543_v53  ;;  %v1546_v56 = vpop.f32.mrb[26].mxu0  ;;  %v732_v57 = vpack.c.bf16 %v722_v52, %v721_v51 }
 0x1c2   : > { %v1547_v58 = vpop.f32.mrb[27].mxu0 }
 0x1c3   : > { %v697_v59 = vadd.f32 %v1545_v55, %v2278_v50  ;;  %v1548_v60 = vadd.f32 %v1547_v58, %v1546_v56  ;;  %926 = vmatmul.mubr.bf16.gmra.mrb[20].mxu1 %v732_v57  ;;  %v990_v57 = vld [vmem:[%s2252_s18 + $0x10] sm:$0xff] }
 0x1c4   : > { %935 = vmatprep.mubr.bf16.mxu1 %v1967_v48 }
 0x1c5   : > { %v700_v61 = vadd.f32 %v1548_v60, %v2278_v50  ;;  %v723_v62 = vmax.f32 %v697_v59, 0.0 }
 0x1c7   : > { %v724_v63 = vmax.f32 %v700_v61, 0.0  ;;  %v1549_v0 = vpop.f32.mrb[28].mxu0 }
 0x1c8   : > { %v1550_v1 = vpop.f32.mrb[29].mxu0 }
 0x1c9   : > { %v1551_v2 = vadd.f32 %v1550_v1, %v1549_v0  ;;  %v1552_v3 = vpop.f32.mrb[30].mxu0  ;;  %v733_v4 = vpack.c.bf16 %v724_v63, %v723_v62  ;;  %v991_v0 = vld [vmem:[%s2252_s18 + $0x18] sm:$0xff] }
 0x1ca   : > { %v1553_v5 = vpop.f32.mrb[31].mxu0 }
 0x1cb   : > { %v705_v6 = vadd.f32 %v1551_v2, %v2278_v50  ;;  %v1554_v7 = vadd.f32 %v1553_v5, %v1552_v3  ;;  %936 = vmatmul.mubr.bf16.gmra.mrb[24].mxu1 %v733_v4 }
 0x1cc   : > { %945 = vmatprep.mubr.bf16.mxu1 %v1967_v48 }
 0x1cd   : > { %v708_v8 = vadd.f32 %v1554_v7, %v2278_v50  ;;  %v725_v9 = vmax.f32 %v705_v6, 0.0 }
 0x1cf   : > { %v726_v10 = vmax.f32 %v708_v8, 0.0 }
 0x1d1   : > { %v734_v11 = vpack.c.bf16 %v726_v10, %v725_v9 }
 0x1d3   : > { %946 = vmatmul.mubr.bf16.gmra.mrb[28].mxu1 %v734_v11 }
 0x26e   : > { %v877_v17 = vpop.f32.mrb[0].mxu1 }
 0x26f   : > { %v879_v18 = vpop.f32.mrb[1].mxu1  ;;  %v878_v32 = vadd.f32 %v877_v17, %v2310_v26 }
 0x270   : > { %v880_v19 = vadd.f32 %v879_v18, %v2306_v16  ;;  %v881_v48 = vpop.f32.mrb[2].mxu1 }
 0x271   : > { %v883_v20 = vpop.f32.mrb[3].mxu1  ;;  %v882_v39 = vadd.f32 %v881_v48, %v2310_v26  ;;  %v1068_v43 = vmul.f32 %v878_v32, %v878_v32 }
 0x272   : > { %v956_v50 = vmul.f32 1.442695, %v880_v19  ;;  %v884_v21 = vadd.f32 %v883_v20, %v2306_v16  ;;  %v1116_v60 = vmul.f32 2.0, %v880_v19 }
 0x273   : > { %v1069_v54 = vmul.f32 %v882_v39, %v882_v39 }
 0x274   : > { %1703 = vpow2.f32 %v956_v50  ;;  %v958_v23 = vmul.f32 1.442695, %v884_v21  ;;  %v1117_v9 = vmul.f32 2.0, %v884_v21 }
 0x276   : > { %1705 = vpow2.f32 %v958_v23  ;;  %v887_v24 = vpop.f32.mrb[4].mxu1  ;;  %v992_v23 = vld [vmem:[%s2252_s18 + $0x20] sm:$0xff] }
 0x277   : > { %v889_v25 = vpop.f32.mrb[5].mxu1  ;;  %v888_v61 = vadd.f32 %v887_v24, %v2310_v26 }
 0x278   : > { %v2313_v27 = vadd.f32 %v889_v25, %v2306_v16  ;;  %v891_v28 = vpop.f32.mrb[6].mxu1 }
 0x279   : > { %v893_v29 = vpop.f32.mrb[7].mxu1  ;;  %v892_v4 = vadd.f32 %v891_v28, %v2310_v26  ;;  %v1070_v13 = vmul.f32 %v888_v61, %v888_v61 }
 0x27a   : > { %v960_v30 = vmul.f32 1.442695, %v2313_v27  ;;  %v2317_v31 = vadd.f32 %v893_v29, %v2306_v16 }
 0x27b   : > { %v1071_v20 = vmul.f32 %v892_v4, %v892_v4 }
 0x27c   : > { %1707 = vpow2.f32 %v960_v30  ;;  %v962_v34 = vmul.f32 1.442695, %v2317_v31  ;;  %v1118_v30 = vmul.f32 2.0, %v2313_v27 }
 0x27e   : > { %v1704_v35 = vpop.eup %1703  ;;  %1709 = vpow2.f32 %v962_v34  ;;  %v897_v37 = vpop.f32.mrb[8].mxu1  ;;  %v993_v34 = vld [vmem:[%s2252_s18 + $0x28] sm:$0xff] }
 0x27f   : > { %v1004_v38 = vmul.f32 %v1704_v35, %v988_v33  ;;  %v899_v40 = vpop.f32.mrb[9].mxu1  ;;  %v1052_v41 = vmul.f32 %v1704_v35, %v1704_v35  ;;  %v898_v28 = vadd.f32 %v897_v37, %v2310_v26 }
 0x280   : > { %v1706_v42 = vpop.eup %1705  ;;  %v2325_v44 = vadd.f32 %v899_v40, %v2306_v16  ;;  %v2327_v45 = vpop.f32.mrb[10].mxu1 }
 0x281   : > { %v1020_v46 = vadd.f32 %v1004_v38, %v878_v32  ;;  %v1005_v47 = vmul.f32 %v1706_v42, %v989_v36  ;;  %v903_v49 = vpop.f32.mrb[11].mxu1  ;;  %v1084_v53 = vadd.f32 %v1068_v43, %v1052_v41  ;;  %v1053_v56 = vmul.f32 %v1706_v42, %v1706_v42 }
 0x282   : > { %v964_v51 = vmul.f32 1.442695, %v2325_v44  ;;  %v2331_v52 = vadd.f32 %v903_v49, %v2306_v16  ;;  %v902_v42 = vadd.f32 %v2327_v45, %v2310_v26 }
 0x283   : > { %1036 = vst [vmem:[%s2334_s16] sm:$0xff] %v1020_v46  ;;  %v1021_v55 = vadd.f32 %v1005_v47, %v882_v39  ;;  %v1100_v59 = vmul.f32 0.591716, %v1084_v53  ;;  %v1085_v62 = vadd.f32 %v1069_v54, %v1053_v56  ;;  %v1119_v46 = vmul.f32 2.0, %v2317_v31 }
 0x284   : > { %1711 = vpow2.f32 %v964_v51  ;;  %v966_v58 = vmul.f32 1.442695, %v2331_v52  ;;  %v1072_v47 = vmul.f32 %v898_v28, %v898_v28 }
 0x285   : > { %1037 = vst [vmem:[%s2334_s16 + $0x8] sm:$0xff] %v1021_v55  ;;  %v1132_v2 = vsub.f32 %v1100_v59, %v1116_v60  ;;  %v1101_v6 = vmul.f32 0.591716, %v1085_v62  ;;  %v1073_v59 = vmul.f32 %v902_v42, %v902_v42  ;;  %v994_v60 = vld [vmem:[%s2252_s18 + $0x30] sm:$0xff]  ;;  %v1120_v62 = vmul.f32 2.0, %v2325_v44 }
 0x286   : > { %v1708_v63 = vpop.eup %1707  ;;  %1713 = vpow2.f32 %v966_v58  ;;  %v2342_v1 = vpop.f32.mrb[12].mxu1 }
 0x287   : > { %v1006_v3 = vmul.f32 %v1708_v63, %v990_v57  ;;  %v909_v5 = vpop.f32.mrb[13].mxu1  ;;  %v1054_v7 = vmul.f32 %v1708_v63, %v1708_v63  ;;  %v1148_v12 = vadd.f32 -0.47527146, %v1132_v2  ;;  %v1133_v48 = vsub.f32 %v1101_v6, %v1117_v9 }
 0x288   : > { %v1710_v8 = vpop.eup %1709  ;;  %v2346_v10 = vadd.f32 %v909_v5, %v2306_v16  ;;  %v2348_v11 = vpop.f32.mrb[14].mxu1  ;;  %v908_v63 = vadd.f32 %v2342_v1, %v2310_v26 }
 0x289   : > { %v1022_v14 = vadd.f32 %v1006_v3, %v888_v61  ;;  %v1007_v15 = vmul.f32 %v1710_v8, %v991_v0  ;;  %v913_v17 = vpop.f32.mrb[15].mxu1  ;;  %1164 = vadd.xlane.f32.xlu0 %v1148_v12  ;;  %v1086_v21 = vadd.f32 %v1070_v13, %v1054_v7  ;;  %v1055_v22 = vmul.f32 %v1710_v8, %v1710_v8  ;;  %v995_v3 = vld [vmem:[%s2252_s18 + $0x38] sm:$0xff] }
 0x28a   : > { %v968_v18 = vmul.f32 1.442695, %v2346_v10  ;;  %v2352_v19 = vadd.f32 %v913_v17, %v2306_v16  ;;  %v1149_v25 = vadd.f32 -0.47527146, %v1133_v48  ;;  %v912_v44 = vadd.f32 %v2348_v11, %v2310_v26 }
 0x28b   : > { %1038 = vst [vmem:[%s2334_s16 + $0x10] sm:$0xff] %v1022_v14  ;;  %v1023_v50 = vadd.f32 %v1007_v15, %v892_v4  ;;  %v1102_v29 = vmul.f32 0.591716, %v1086_v21  ;;  %v1087_v32 = vadd.f32 %v1071_v20, %v1055_v22  ;;  %v1121_v17 = vmul.f32 2.0, %v2331_v52 }
 0x28c   : > { %1715 = vpow2.f32 %v968_v18  ;;  %v970_v24 = vmul.f32 1.442695, %v2352_v19  ;;  %v1074_v18 = vmul.f32 %v908_v63, %v908_v63 }
 0x28d   : > { %1039 = vst [vmem:[%s2334_s16 + $0x18] sm:$0xff] %v1023_v50  ;;  %1166 = vadd.xlane.f32.xlu0 %v1149_v25  ;;  %v1134_v39 = vsub.f32 %v1102_v29, %v1118_v30  ;;  %v1103_v40 = vmul.f32 0.591716, %v1087_v32  ;;  %v996_v29 = vld [vmem:[%s2252_s18 + $0x40] sm:$0xff]  ;;  %v1122_v32 = vmul.f32 2.0, %v2346_v10 }
 0x28e   : > { %v1712_v33 = vpop.eup %1711  ;;  %1717 = vpow2.f32 %v970_v24  ;;  %v2361_v35 = vpop.f32.mrb[16].mxu1 }
 0x28f   : > { %v1008_v36 = vmul.f32 %v1712_v33, %v992_v23  ;;  %v919_v38 = vpop.f32.mrb[17].mxu1  ;;  %v1056_v43 = vmul.f32 %v1712_v33, %v1712_v33  ;;  %v1150_v45 = vadd.f32 -0.47527146, %v1134_v39  ;;  %v1135_v57 = vsub.f32 %v1103_v40, %v1119_v46  ;;  %v997_v39 = vld [vmem:[%s2252_s18 + $0x48] sm:$0xff] }
 0x290   : > { %v1714_v41 = vpop.eup %1713  ;;  %v2366_v37 = vadd.f32 %v919_v38, %v2306_v16  ;;  %v2368_v27 = vpop.f32.mrb[18].mxu1  ;;  %v918_v33 = vadd.f32 %v2361_v35, %v2310_v26 }
 0x291   : > { %v1024_v49 = vadd.f32 %v1008_v36, %v898_v28  ;;  %v1009_v51 = vmul.f32 %v1714_v41, %v993_v34  ;;  %v923_v53 = vpop.f32.mrb[19].mxu1  ;;  %v1088_v58 = vadd.f32 %v1072_v47, %v1056_v43  ;;  %1168 = vadd.xlane.f32.xlu1 %v1150_v45  ;;  %v1057_v61 = vmul.f32 %v1714_v41, %v1714_v41 }
 0x292   : > { %v972_v54 = vmul.f32 1.442695, %v2366_v37  ;;  %v2373_v55 = vadd.f32 %v923_v53, %v2306_v16  ;;  %v1151_v4 = vadd.f32 -0.47527146, %v1135_v57  ;;  %v1075_v28 = vmul.f32 %v912_v44, %v912_v44 }
 0x293   : > { %1040 = vst [vmem:[%s2334_s16 + $0x20] sm:$0xff] %v1024_v49  ;;  %v1025_v56 = vadd.f32 %v1009_v51, %v902_v42  ;;  %v1104_v0 = vmul.f32 0.591716, %v1088_v58  ;;  %v1089_v6 = vadd.f32 %v1073_v59, %v1057_v61  ;;  %v922_v10 = vadd.f32 %v2368_v27, %v2310_v26 }
 0x294   : > { %1719 = vpow2.f32 %v972_v54  ;;  %v974_v31 = vmul.f32 1.442695, %v2373_v55  ;;  %v1123_v54 = vmul.f32 2.0, %v2352_v19  ;;  %v1076_v45 = vmul.f32 %v918_v33, %v918_v33 }
 0x295   : > { %1041 = vst [vmem:[%s2334_s16 + $0x28] sm:$0xff] %v1025_v56  ;;  %v1136_v9 = vsub.f32 %v1104_v0, %v1120_v62  ;;  %1170 = vadd.xlane.f32.xlu1 %v1151_v4  ;;  %v1105_v15 = vmul.f32 0.591716, %v1089_v6  ;;  %v998_v0 = vld [vmem:[%s2252_s18 + $0x50] sm:$0xff] }
 0x296   : > { %v1716_v2 = vpop.eup %1715  ;;  %1721 = vpow2.f32 %v974_v31  ;;  %v2383_v5 = vpop.f32.mrb[20].mxu1 }
 0x297   : > { %v1010_v7 = vmul.f32 %v1716_v2, %v994_v60  ;;  %v929_v8 = vpop.f32.mrb[21].mxu1  ;;  %v1058_v12 = vmul.f32 %v1716_v2, %v1716_v2  ;;  %v1152_v11 = vadd.f32 -0.47527146, %v1136_v9  ;;  %v1137_v24 = vsub.f32 %v1105_v15, %v1121_v17  ;;  %v999_v9 = vld [vmem:[%s2252_s18 + $0x58] sm:$0xff] }
 0x298   : > { %v1718_v13 = vpop.eup %1717  ;;  %v2388_v1 = vadd.f32 %v929_v8, %v2306_v16  ;;  %v2390_v14 = vpop.f32.mrb[22].mxu1  ;;  %v928_v4 = vadd.f32 %v2383_v5, %v2310_v26 }
 0x299   : > { %v1026_v48 = vadd.f32 %v1010_v7, %v908_v63  ;;  %v1011_v20 = vmul.f32 %v1718_v13, %v995_v3  ;;  %v933_v50 = vpop.f32.mrb[23].mxu1  ;;  %v1090_v25 = vadd.f32 %v1074_v18, %v1058_v12  ;;  %1172 = vadd.xlane.f32.xlu0 %v1152_v11  ;;  %v1059_v30 = vmul.f32 %v1718_v13, %v1718_v13 }
 0x29a   : > { %v976_v21 = vmul.f32 1.442695, %v2388_v1  ;;  %v2395_v22 = vadd.f32 %v933_v50, %v2306_v16  ;;  %v1153_v34 = vadd.f32 -0.47527146, %v1137_v24  ;;  %v1077_v63 = vmul.f32 %v922_v10, %v922_v10 }
 0x29b   : > { %1042 = vst [vmem:[%s2334_s16 + $0x30] sm:$0xff] %v1026_v48  ;;  %v1027_v23 = vadd.f32 %v1011_v20, %v912_v44  ;;  %v1106_v36 = vmul.f32 0.591716, %v1090_v25  ;;  %v1091_v41 = vadd.f32 %v1075_v28, %v1059_v30  ;;  %v1124_v3 = vmul.f32 2.0, %v2366_v37 }
 0x29c   : > { %1723 = vpow2.f32 %v976_v21  ;;  %v978_v52 = vmul.f32 1.442695, %v2395_v22  ;;  %1174 = vadd.xlane.f32.xlu1 %v1153_v34  ;;  %v932_v37 = vadd.f32 %v2390_v14, %v2310_v26  ;;  %v1125_v21 = vmul.f32 2.0, %v2373_v55  ;;  %v1000_v55 = vld [vmem:[%s2252_s18 + $0x60] sm:$0xff] }
 0x29d   : > { %1043 = vst [vmem:[%s2334_s16 + $0x38] sm:$0xff] %v1027_v23  ;;  %v1138_v46 = vsub.f32 %v1106_v36, %v1122_v32  ;;  %v1107_v53 = vmul.f32 0.591716, %v1091_v41  ;;  %v1078_v11 = vmul.f32 %v928_v4, %v928_v4 }
 0x29e   : > { %v1720_v38 = vpop.eup %1719  ;;  %1725 = vpow2.f32 %v978_v52  ;;  %v937_v40 = vpop.f32.mrb[24].mxu1  ;;  %v1079_v34 = vmul.f32 %v932_v37, %v932_v37 }
 0x29f   : > { %v1012_v42 = vmul.f32 %v1720_v38, %v996_v29  ;;  %v939_v43 = vpop.f32.mrb[25].mxu1  ;;  %v1060_v47 = vmul.f32 %v1720_v38, %v1720_v38  ;;  %v1154_v27 = vadd.f32 -0.47527146, %v1138_v46  ;;  %v1139_v61 = vsub.f32 %v1107_v53, %v1123_v54  ;;  %v1001_v46 = vld [vmem:[%s2252_s18 + $0x68] sm:$0xff] }
 0x2a0   : > { %v1722_v49 = vpop.eup %1721  ;;  %v2408_v51 = vadd.f32 %v939_v43, %v2306_v16  ;;  %v2410_v35 = vpop.f32.mrb[26].mxu1  ;;  %v938_v30 = vadd.f32 %v937_v40, %v2310_v26 }
 0x2a1   : > { %v1028_v56 = vadd.f32 %v1012_v42, %v918_v33  ;;  %v1013_v57 = vmul.f32 %v1722_v49, %v997_v39  ;;  %v943_v58 = vpop.f32.mrb[27].mxu1  ;;  %v1092_v62 = vadd.f32 %v1076_v45, %v1060_v47  ;;  %1176 = vadd.xlane.f32.xlu0 %v1154_v27  ;;  %v1061_v2 = vmul.f32 %v1722_v49, %v1722_v49 }
 0x2a2   : > { %v980_v59 = vmul.f32 1.442695, %v2408_v51  ;;  %v2415_v60 = vadd.f32 %v943_v58, %v2306_v16  ;;  %v1155_v6 = vadd.f32 -0.47527146, %v1139_v61  ;;  %v1126_v39 = vmul.f32 2.0, %v2388_v1 }
 0x2a3   : > { %1044 = vst [vmem:[%s2334_s16 + $0x40] sm:$0xff] %v1028_v56  ;;  %v1029_v31 = vadd.f32 %v1013_v57, %v922_v10  ;;  %v1108_v7 = vmul.f32 0.591716, %v1092_v62  ;;  %v1093_v13 = vadd.f32 %v1077_v63, %v1061_v2  ;;  %v942_v43 = vadd.f32 %v2410_v35, %v2310_v26 }
 0x2a4   : > { %1727 = vpow2.f32 %v980_v59  ;;  %v982_v19 = vmul.f32 1.442695, %v2415_v60  ;;  %1178 = vadd.xlane.f32.xlu1 %v1155_v6  ;;  %v1080_v47 = vmul.f32 %v938_v30, %v938_v30  ;;  %v1127_v1 = vmul.f32 2.0, %v2395_v22 }
 0x2a5   : > { %1045 = vst [vmem:[%s2334_s16 + $0x48] sm:$0xff] %v1029_v31  ;;  %v1140_v17 = vsub.f32 %v1108_v7, %v1124_v3  ;;  %v1109_v50 = vmul.f32 0.591716, %v1093_v13  ;;  %v1081_v35 = vmul.f32 %v942_v43, %v942_v43  ;;  %v1128_v61 = vmul.f32 2.0, %v2408_v51 }
 0x2a6   : > { %v1724_v8 = vpop.eup %1723  ;;  %1729 = vpow2.f32 %v982_v19  ;;  %v947_v12 = vpop.f32.mrb[28].mxu1  ;;  %v1002_v19 = vld [vmem:[%s2252_s18 + $0x70] sm:$0xff]  ;;  %v1129_v7 = vmul.f32 2.0, %v2415_v60 }
 0x2a7   : > { %v1014_v44 = vmul.f32 %v1724_v8, %v998_v0  ;;  %v949_v15 = vpop.f32.mrb[29].mxu1  ;;  %v1062_v18 = vmul.f32 %v1724_v8, %v1724_v8  ;;  %v1156_v52 = vadd.f32 -0.47527146, %v1140_v17  ;;  %v1141_v32 = vsub.f32 %v1109_v50, %v1125_v21  ;;  %v1003_v8 = vld [vmem:[%s2252_s18 + $0x78] sm:$0xff] }
 0x2a8   : > { %v1726_v48 = vpop.eup %1725  ;;  %v2428_v20 = vadd.f32 %v949_v15, %v2306_v16  ;;  %v951_v5 = vpop.f32.mrb[30].mxu1  ;;  %v948_v63 = vadd.f32 %v947_v12, %v2310_v26 }
 0x2a9   : > { %v1030_v23 = vadd.f32 %v1014_v44, %v928_v4  ;;  %v1015_v24 = vmul.f32 %v1726_v48, %v999_v9  ;;  %v953_v25 = vpop.f32.mrb[31].mxu1  ;;  %v1094_v33 = vadd.f32 %v1078_v11, %v1062_v18  ;;  %1180 = vadd.xlane.f32.xlu0 %v1156_v52  ;;  %v1063_v38 = vmul.f32 %v1726_v48, %v1726_v48 }
 0x2aa   : > { %v984_v28 = vmul.f32 1.442695, %v2428_v20  ;;  %v2433_v29 = vadd.f32 %v953_v25, %v2306_v16  ;;  %v1157_v16 = vadd.f32 -0.47527146, %v1141_v32  ;;  %v952_v22 = vadd.f32 %v951_v5, %v2310_v26 }
 0x2ab   : > { %1046 = vst [vmem:[%s2334_s16 + $0x50] sm:$0xff] %v1030_v23  ;;  %v1031_v14 = vadd.f32 %v1015_v24, %v932_v37  ;;  %v1110_v41 = vmul.f32 0.591716, %v1094_v33  ;;  %v1095_v40 = vadd.f32 %v1079_v34, %v1063_v38  ;;  %v1082_v51 = vmul.f32 %v948_v63, %v948_v63 }
 0x2ac   : > { %1731 = vpow2.f32 %v984_v28  ;;  %v986_v36 = vmul.f32 1.442695, %v2433_v29  ;;  %1182 = vadd.xlane.f32.xlu1 %v1157_v16  ;;  %v1083_v17 = vmul.f32 %v952_v22, %v952_v22  ;;  %v1130_v60 = vmul.f32 2.0, %v2428_v20 }
 0x2ad   : > { %1047 = vst [vmem:[%s2334_s16 + $0x58] sm:$0xff] %v1031_v14  ;;  %v1142_v10 = vsub.f32 %v1110_v41, %v1126_v39  ;;  %v1111_v45 = vmul.f32 0.591716, %v1095_v40  ;;  %v1131_v24 = vmul.f32 2.0, %v2433_v29 }
 0x2ae   : > { %v1728_v42 = vpop.eup %1727  ;;  %1733 = vpow2.f32 %v986_v36 }
 0x2af   : > { %v1016_v49 = vmul.f32 %v1728_v42, %v1000_v55  ;;  %v1064_v53 = vmul.f32 %v1728_v42, %v1728_v42  ;;  %v1158_v58 = vadd.f32 -0.47527146, %v1142_v10  ;;  %v1143_v27 = vsub.f32 %v1111_v45, %v1127_v1 }
 0x2b0   : > { %v1730_v54 = vpop.eup %1729 }
 0x2b1   : > { %v1032_v56 = vadd.f32 %v1016_v49, %v938_v30  ;;  %v1017_v57 = vmul.f32 %v1730_v54, %v1001_v46  ;;  %v1096_v59 = vadd.f32 %v1080_v47, %v1064_v53  ;;  %v1065_v31 = vmul.f32 %v1730_v54, %v1730_v54  ;;  %1184 = vadd.xlane.f32.xlu0 %v1158_v58 }
 0x2b2   : > { %v1159_v2 = vadd.f32 -0.47527146, %v1143_v27 }
 0x2b3   : > { %1048 = vst [vmem:[%s2334_s16 + $0x60] sm:$0xff] %v1032_v56  ;;  %v1033_v62 = vadd.f32 %v1017_v57, %v942_v43  ;;  %v1112_v0 = vmul.f32 0.591716, %v1096_v59  ;;  %v1097_v3 = vadd.f32 %v1081_v35, %v1065_v31 }
 0x2b4   : > { %1186 = vadd.xlane.f32.xlu1 %v1159_v2 }
 0x2b5   : > { %1049 = vst [vmem:[%s2334_s16 + $0x68] sm:$0xff] %v1033_v62  ;;  %v1144_v4 = vsub.f32 %v1112_v0, %v1128_v61  ;;  %v1113_v9 = vmul.f32 0.591716, %v1097_v3 }
 0x2b6   : > { %v1732_v6 = vpop.eup %1731 }
 0x2b7   : > { %v1018_v13 = vmul.f32 %v1732_v6, %v1002_v19  ;;  %v1160_v44 = vadd.f32 -0.47527146, %v1144_v4  ;;  %v1066_v12 = vmul.f32 %v1732_v6, %v1732_v6  ;;  %v1145_v18 = vsub.f32 %v1113_v9, %v1129_v7 }
 0x2b8   : > { %v1734_v15 = vpop.eup %1733 }
 0x2b9   : > { %v1034_v26 = vadd.f32 %v1018_v13, %v948_v63  ;;  %v1019_v48 = vmul.f32 %v1734_v15, %v1003_v8  ;;  %1188 = vadd.xlane.f32.xlu0 %v1160_v44  ;;  %v1098_v37 = vadd.f32 %v1082_v51, %v1066_v12  ;;  %v1067_v5 = vmul.f32 %v1734_v15, %v1734_v15 }
 0x2ba   : > { %v1161_v50 = vadd.f32 -0.47527146, %v1145_v18 }
 0x2bb   : > { %1050 = vst [vmem:[%s2334_s16 + $0x70] sm:$0xff] %v1034_v26  ;;  %v1035_v21 = vadd.f32 %v1019_v48, %v952_v22  ;;  %v1114_v11 = vmul.f32 0.591716, %v1098_v37  ;;  %v1099_v23 = vadd.f32 %v1083_v17, %v1067_v5 }
 0x2bc   : > { %1190 = vadd.xlane.f32.xlu1 %v1161_v50 }
 0x2bd   : > { %1051 = vst [vmem:[%s2334_s16 + $0x78] sm:$0xff] %v1035_v21  ;;  %v1146_v25 = vsub.f32 %v1114_v11, %v1130_v60  ;;  %v1115_v28 = vmul.f32 0.591716, %v1099_v23 }
 0x2bf   : > { %v1162_v52 = vadd.f32 -0.47527146, %v1146_v25  ;;  %v1147_v14 = vsub.f32 %v1115_v28, %v1131_v24 }
 0x2c1   : > { %1192 = vadd.xlane.f32.xlu0 %v1162_v52  ;;  %v1163_v30 = vadd.f32 -0.47527146, %v1147_v14 }
 0x2c3   : > { %1194 = vadd.xlane.f32.xlu1 %v1163_v30 }
 0x2c4   : > { %1864 = shalt.err (!%p1861_p7)
}
 0x2c5   : > { %s1865_s17 = scalar_lea.hbm %s2463_s19, 2048  ;;  %s1869_s30 = scalar_lea.hbm %s2575_s6, 4096 }
 0x2c6   : > { %p1866_p3 = scmp.ne.s32.totalorder %s2463_s19, %s1865_s17  ;;  %p1870_p0 = scmp.lt.u32.totalorder %s2463_s19, %s2575_s6 }
 0x2c7   : > { %p1871_p11 = scmp.lt.u32.totalorder %s1869_s30, %s1865_s17  ;;  %p1873_p1 = scmp.lt.u32.totalorder %s1865_s17, %s2463_s19 }
 0x2c8   : > { %p1867_p5 = pnand %p1866_p3, %p2610_p12 }
 0x2c9   : > { %p1872_p8 = por %p1871_p11, %p1870_p0 }
 0x2ca   : > { %p1868_p9 = pneg %p1867_p5 }
 0x2cb   : > { %p1874_p2 = por %p1873_p1, %p1872_p8 }
 0x2cd   : > { %p1875_p13 = pnand %p1874_p2, %p1868_p9 }
 0x2cf   : > { %1878 = shalt.err (!%p1875_p13)
}
 0x2d0   : > { %s1969_s23 = smov 128   ;;  %s1970_s16 = smov 8  }
 0x2d1   : > { %1567 = dma.vmem_to_hbm [thread:$0]  (%p2610_p12), %s2466_s3, 2048, %s2463_s19, %s1229_s11, %s1969_s23, %s1969_s23, %s1970_s16  }
 0x2d2   : > { %s2496_s22 = scalar_lea.vmem [#allocation11], %s2236_s13  ;;  %s2519_s3 = scalar_lea.hbm %s2576_s7, %s1489_s29 }
 0x2d3   : > { %s1263_s13 = sshll.u32 %s2496_s22, 4  ;;  %s1234_s11 = scalar_lea.sflag [#allocation12], %s2233_s0  ;;  %s2521_s13 = int_to_ptr.vmem [resolvable:$true] %s1263_s13 }
 0x2d4   : > { %s1879_s10 = scalar_lea.vmem %s2521_s13, 2048  ;;  %s1971_s21 = smov [#allocation11]  }
 0x2d5   : > { %p1880_p6 = scmp.ne.s32.totalorder %s2521_s13, %s1879_s10  ;;  %s1883_s26 = sshll.u32 %s1971_s21, 4  ;;  %s1884_s26 = int_to_ptr.vmem [resolvable:$false] %s1883_s26 }
 0x2d6   : > { %s1885_s28 = scalar_lea.vmem %s1884_s26, 4096  ;;  %p1886_p7 = scmp.lt.s32.totalorder %s2521_s13, %s1884_s26 }
 0x2d7   : > { %p1881_p10 = pnand %p1880_p6, %p2610_p12  ;;  %p1887_p3 = scmp.lt.s32.totalorder %s1885_s28, %s1879_s10 }
 0x2d9   : > { %p1882_p4 = pneg %p1881_p10  ;;  %p1888_p5 = por %p1887_p3, %p1886_p7 }
 0x2db   : > { %p1889_p9 = pnand %p1888_p5, %p1882_p4 }
 0x316   : > { %v1165_v20 = vpop.xlane.xlu0 %1164 }
 0x317   : > { %v1196_v29 = vmul.f32 0.5, %v1165_v20 }
 0x319   : > { %1212 = vst [vmem:[%s2496_s22] sm:$0xff] %v1196_v29 }
 0x31a   : > { %v1167_v32 = vpop.xlane.xlu0 %1166 }
 0x31b   : > { %v1197_v33 = vmul.f32 0.5, %v1167_v32 }
 0x31d   : > { %1213 = vst [vmem:[%s2496_s22 + $0x8] sm:$0xff] %v1197_v33 }
 0x31e   : > { %v1169_v34 = vpop.xlane.xlu1 %1168 }
 0x31f   : > { %v1198_v55 = vmul.f32 0.5, %v1169_v34 }
 0x321   : > { %1214 = vst [vmem:[%s2496_s22 + $0x10] sm:$0xff] %v1198_v55 }
 0x322   : > { %v1171_v36 = vpop.xlane.xlu1 %1170 }
 0x323   : > { %v1199_v38 = vmul.f32 0.5, %v1171_v36 }
 0x325   : > { %1215 = vst [vmem:[%s2496_s22 + $0x18] sm:$0xff] %v1199_v38 }
 0x326   : > { %v1173_v39 = vpop.xlane.xlu0 %1172 }
 0x327   : > { %v1200_v16 = vmul.f32 0.5, %v1173_v39 }
 0x329   : > { %1216 = vst [vmem:[%s2496_s22 + $0x20] sm:$0xff] %v1200_v16  ;;  %v1175_v41 = vpop.xlane.xlu1 %1174 }
 0x32a   : > { %v1201_v42 = vmul.f32 0.5, %v1175_v41 }
 0x32c   : > { %1217 = vst [vmem:[%s2496_s22 + $0x28] sm:$0xff] %v1201_v42 }
 0x32e   : > { %v1177_v43 = vpop.xlane.xlu0 %1176 }
 0x32f   : > { %v1202_v46 = vmul.f32 0.5, %v1177_v43 }
 0x331   : > { %1218 = vst [vmem:[%s2496_s22 + $0x30] sm:$0xff] %v1202_v46  ;;  %v1179_v40 = vpop.xlane.xlu1 %1178 }
 0x332   : > { %v1203_v47 = vmul.f32 0.5, %v1179_v40 }
 0x334   : > { %1219 = vst [vmem:[%s2496_s22 + $0x38] sm:$0xff] %v1203_v47 }
 0x336   : > { %v1181_v49 = vpop.xlane.xlu0 %1180 }
 0x337   : > { %v1204_v10 = vmul.f32 0.5, %v1181_v49 }
 0x339   : > { %1220 = vst [vmem:[%s2496_s22 + $0x40] sm:$0xff] %v1204_v10  ;;  %v1183_v53 = vpop.xlane.xlu1 %1182 }
 0x33a   : > { %v1205_v54 = vmul.f32 0.5, %v1183_v53 }
 0x33c   : > { %1221 = vst [vmem:[%s2496_s22 + $0x48] sm:$0xff] %v1205_v54 }
 0x33e   : > { %v1185_v1 = vpop.xlane.xlu0 %1184 }
 0x33f   : > { %v1206_v45 = vmul.f32 0.5, %v1185_v1 }
 0x341   : > { %1222 = vst [vmem:[%s2496_s22 + $0x50] sm:$0xff] %v1206_v45  ;;  %v1187_v56 = vpop.xlane.xlu1 %1186 }
 0x342   : > { %v1207_v57 = vmul.f32 0.5, %v1187_v56 }
 0x344   : > { %1223 = vst [vmem:[%s2496_s22 + $0x58] sm:$0xff] %v1207_v57 }
 0x346   : > { %v1189_v58 = vpop.xlane.xlu0 %1188 }
 0x347   : > { %v1208_v59 = vmul.f32 0.5, %v1189_v58 }
 0x349   : > { %1224 = vst [vmem:[%s2496_s22 + $0x60] sm:$0xff] %v1208_v59  ;;  %v1191_v35 = vpop.xlane.xlu1 %1190 }
 0x34a   : > { %v1209_v27 = vmul.f32 0.5, %v1191_v35 }
 0x34c   : > { %1225 = vst [vmem:[%s2496_s22 + $0x68] sm:$0xff] %v1209_v27 }
 0x34e   : > { %v1193_v31 = vpop.xlane.xlu0 %1192 }
 0x34f   : > { %v1210_v61 = vmul.f32 0.5, %v1193_v31 }
 0x350   : > { %v1195_v62 = vpop.xlane.xlu1 %1194 }
 0x351   : > { %1226 = vst [vmem:[%s2496_s22 + $0x70] sm:$0xff] %v1210_v61  ;;  %v1211_v63 = vmul.f32 0.5, %v1195_v62 }
 0x353   : > { %1227 = vst [vmem:[%s2496_s22 + $0x78] sm:$0xff] %v1211_v63 }
 0x354   : > { %1892 = shalt.err (!%p1889_p9)
}
 0x355   : > { %s1893_s29 = scalar_lea.hbm %s2519_s3, 2048  ;;  %s1897_s9 = scalar_lea.hbm %s2576_s7, 4096 }
 0x356   : > { %p1894_p0 = scmp.ne.s32.totalorder %s2519_s3, %s1893_s29  ;;  %p1898_p1 = scmp.lt.u32.totalorder %s2519_s3, %s2576_s7 }
 0x357   : > { %p1899_p2 = scmp.lt.u32.totalorder %s1897_s9, %s1893_s29  ;;  %p1901_p6 = scmp.lt.u32.totalorder %s1893_s29, %s2519_s3 }
 0x358   : > { %p1895_p11 = pnand %p1894_p0, %p2610_p12 }
 0x359   : > { %p1900_p13 = por %p1899_p2, %p1898_p1 }
 0x35a   : > { %p1896_p8 = pneg %p1895_p11 }
 0x35b   : > { %p1902_p10 = por %p1901_p6, %p1900_p13 }
 0x35d   : > { %p1903_p4 = pnand %p1902_p10, %p1896_p8 }
 0x35f   : > { %1906 = shalt.err (!%p1903_p4)
}
 0x360   : > { %1568 = dma.vmem_to_hbm [thread:$0]  (%p2610_p12), %s2521_s13, 2048, %s2519_s3, %s1234_s11, %s1969_s23, %s1969_s23, %s1970_s16  }
 0x361 PF: > { %s1278_s20 = sand.u32 1, %s1945_s24   ;;  %p2611_p7 = scmp.ne.s32.totalorder %s2593_s8, 0 }
 0x362   : > { %p2612_p3 = scmp.ge.s32.totalorder %s1957_s27, 2  ;;  %s1279_s1 = scalar_lea.sflag [#allocation4], %s1278_s20 }
 0x364   : > { %p1586_p5 = pnand %p2612_p3, %p2611_p7 }
 0x366   : > { %1936 = dma.done.wait (!%p1586_p5), %s1279_s1, 2048  }
 0x367   : > { %1938 = vsyncadd (!%p1586_p5), %s1279_s1, 4294965248  ;;  %s1288_s12 = scalar_lea.sflag [#allocation12], %s1278_s20 }
 0x368   : > { %1940 = dma.done.wait (!%p1586_p5), %s1288_s12, 2048  }
 0x369   : > { %1942 = vsyncadd (!%p1586_p5), %s1288_s12, 4294965248  ;;  %s2613_s27 = sld [smem:[#allocation19_spill]]  ;;  %s2614_s0 = sld [smem:[#allocation18_spill]] }
 0x36a   : > { %s2615_s26 = sld [smem:[#allocation20_spill]]  ;;  %s2616_s24 = smov %s1949_s25 }
 0x36f   : > { %p28_p12 = scmp.ge.s32.totalorder %s2613_s27, 4   ;;  %s2617_s25 = smov %s2614_s0 }
 0x371   :  { %30 = sbr.rel (!%p28_p12) target bundleno = 14 (0xe), region = 127 }
 0x378   :  { %1293 = vsyncpa [#allocation3], 1 }
 0x379   :  { %1295 = vsyncpa [#allocation3 + $0x1], 1 }
 0x37a   :  { %1296 = vsyncpa [#allocation6], 1 }
 0x37b   :  { %1297 = vsyncpa [#allocation9], 1 }
 0x37c   :  { %1299 = vsyncpa [#allocation9 + $0x1], 1 }
 0x37d   :  { %1300 = vsyncpa [#allocation4], 1 }
 0x37e   :  { %1302 = vsyncpa [#allocation4 + $0x1], 1 }
 0x37f   :  { %1303 = vsyncpa [#allocation12], 1 }
 0x380   :  { %1305 = vsyncpa [#allocation12 + $0x1], 1 }

</bundles_post_ra>
